<compile_context>
chip_gen: v5e
topology: v5e:2x2
jax: 0.10.0
libtpu: 0.0.40
codegen_flags: <defaults>
</compile_context>

<pallas_src>
import functools
import math

import jax
import jax.numpy as jnp
from jax.experimental import pallas as pl
from jax.experimental.pallas import tpu as pltpu


def _round_up(x, m):
    return ((x + m - 1) // m) * m


def _cdiv(a, b):
    return -(-a // b)


def _fold_factor(M, C):
    """Smallest f with (C*f) % 128 == 0 and M % f == 0, for lane-dense tiles."""
    if C % 128 == 0:
        return 1
    f = 128 // math.gcd(C, 128)
    return f if (M % f == 0) else 1


def _row_tiling(R, max_rows=1024):
    """(tile_rows, padded_rows) for a row-tiled elementwise grid."""
    if R <= max_rows:
        return R, R
    return max_rows, _round_up(R, max_rows)


# ----------------------------------------------------------------------------
# Pallas kernel 1: tiled bf16 matmul with fused affine (+bias / +ReLU) epilogue
# ----------------------------------------------------------------------------
def _matmul_affine_kernel(a_ref, b_ref, s_ref, c_ref, o_ref, acc_ref, *, apply_relu):
    k = pl.program_id(2)

    @pl.when(k == 0)
    def _():
        acc_ref[...] = jnp.zeros_like(acc_ref)

    acc_ref[...] += jnp.dot(a_ref[...], b_ref[...],
                            preferred_element_type=jnp.float32)

    @pl.when(k == pl.num_programs(2) - 1)
    def _():
        y = acc_ref[...] * s_ref[...] + c_ref[...]
        if apply_relu:
            y = jnp.maximum(y, 0.0)
        o_ref[...] = y.astype(o_ref.dtype)


def matmul_affine(a, b, scale=None, shift=None, relu=False):
    """out = maybe_relu((a @ b) * scale + shift); MXU in bf16, f32 accumulation."""
    M, K = a.shape
    K2, N = b.shape
    assert K == K2
    if scale is None:
        scale = jnp.ones((N,), jnp.float32)
    if shift is None:
        shift = jnp.zeros((N,), jnp.float32)

    # Tile selection: pad only to tile granularity, K-aware tk, N-tiles outermost.
    tm = 128 if M >= 128 else _round_up(M, 16)          # bf16-friendly sublanes
    Mp = _round_up(M, tm)
    Np = _round_up(N, 128)
    tn = 256 if (Np % 256 == 0 and Mp // tm >= 2) else 128
    Kp = _round_up(K, 128)
    max_tk = 2048
    if Kp <= max_tk:
        tk = Kp
    else:
        ksteps = _cdiv(Kp, max_tk)
        tk = _round_up(_cdiv(Kp, ksteps), 128)
        Kp = tk * ksteps

    a_bf = a.astype(jnp.bfloat16)
    b_bf = b.astype(jnp.bfloat16)
    if (Mp, Kp) != (M, K):
        a_bf = jnp.pad(a_bf, ((0, Mp - M), (0, Kp - K)))
    if (Kp, Np) != (K, N):
        b_bf = jnp.pad(b_bf, ((0, Kp - K), (0, Np - N)))
    s_p = scale.astype(jnp.float32).reshape(1, N)
    c_p = shift.astype(jnp.float32).reshape(1, N)
    if Np != N:
        s_p = jnp.pad(s_p, ((0, 0), (0, Np - N)))
        c_p = jnp.pad(c_p, ((0, 0), (0, Np - N)))

    grid = (Np // tn, Mp // tm, Kp // tk)   # N-tiles outermost -> megacore when M tiles == 1
    out = pl.pallas_call(
        functools.partial(_matmul_affine_kernel, apply_relu=relu),
        out_shape=jax.ShapeDtypeStruct((Mp, Np), jnp.float32),
        grid_spec=pltpu.PrefetchScalarGridSpec(
            num_scalar_prefetch=0,
            grid=grid,
            in_specs=[
                pl.BlockSpec((tm, tk), lambda j, i, k: (i, k)),
                pl.BlockSpec((tk, tn), lambda j, i, k: (k, j)),
                pl.BlockSpec((1, tn), lambda j, i, k: (0, j)),
                pl.BlockSpec((1, tn), lambda j, i, k: (0, j)),
            ],
            out_specs=pl.BlockSpec((tm, tn), lambda j, i, k: (i, j)),
            scratch_shapes=[pltpu.VMEM((tm, tn), jnp.float32)],
        ),
        compiler_params=pltpu.CompilerParams(
            dimension_semantics=("parallel", "parallel", "arbitrary")),
    )(a_bf, b_bf, s_p, c_p)
    if (Mp, Np) != (M, N):
        out = out[:M, :N]
    return out


# ----------------------------------------------------------------------------
# Shared row-tiled elementwise launcher (lane-dense blocks, pipelined DMA)
# ----------------------------------------------------------------------------
def _ew_call(kernel, row_arrays, vec_arrays):
    """row_arrays: list of (R, L) f32; vec_arrays: (L,) f32 broadcast over rows."""
    R, L = row_arrays[0].shape
    tr, Rp = _row_tiling(R)
    if Rp != R:
        row_arrays = [jnp.pad(a, ((0, Rp - R), (0, 0))) for a in row_arrays]
    vec_arrays = [v.astype(jnp.float32).reshape(1, L) for v in vec_arrays]
    in_specs = ([pl.BlockSpec((tr, L), lambda i: (i, 0))] * len(row_arrays)
                + [pl.BlockSpec((1, L), lambda i: (0, 0))] * len(vec_arrays))
    out = pl.pallas_call(
        kernel,
        out_shape=jax.ShapeDtypeStruct((Rp, L), jnp.float32),
        grid_spec=pltpu.PrefetchScalarGridSpec(
            num_scalar_prefetch=0,
            grid=(Rp // tr,),
            in_specs=in_specs,
            out_specs=pl.BlockSpec((tr, L), lambda i: (i, 0)),
        ),
        compiler_params=pltpu.CompilerParams(dimension_semantics=("parallel",)),
    )(*row_arrays, *vec_arrays)
    return out if Rp == R else out[:R]


# ----------------------------------------------------------------------------
# Pallas kernel 2: affine (+ReLU)  — BatchNorm apply
# ----------------------------------------------------------------------------
def _affine_kernel(x_ref, s_ref, c_ref, o_ref, *, relu):
    y = x_ref[...] * s_ref[...] + c_ref[...]
    if relu:
        y = jnp.maximum(y, 0.0)
    o_ref[...] = y


def affine_act(x_nhwc, scale, shift, relu):
    B, H, W, C = x_nhwc.shape
    M = B * H * W
    f = _fold_factor(M, C)
    xf = x_nhwc.reshape(M // f, C * f)
    out = _ew_call(functools.partial(_affine_kernel, relu=relu),
                   [xf], [jnp.tile(scale, f), jnp.tile(shift, f)])
    return out.reshape(B, H, W, C)


# ----------------------------------------------------------------------------
# Pallas kernel 3: fused block tail  relu(bn2(out) + bn_ds(identity))
# ----------------------------------------------------------------------------
def _affine2_relu_kernel(x_ref, y_ref, s1_ref, c1_ref, s2_ref, c2_ref, o_ref):
    v = (x_ref[...] * s1_ref[...] + c1_ref[...]
         + y_ref[...] * s2_ref[...] + c2_ref[...])
    o_ref[...] = jnp.maximum(v, 0.0)


def bn_add_relu(x_nhwc, s1, c1, y_nhwc, s2, c2):
    B, H, W, C = x_nhwc.shape
    M = B * H * W
    f = _fold_factor(M, C)
    xf = x_nhwc.reshape(M // f, C * f)
    yf = y_nhwc.reshape(M // f, C * f)
    out = _ew_call(_affine2_relu_kernel, [xf, yf],
                   [jnp.tile(s1, f), jnp.tile(c1, f),
                    jnp.tile(s2, f), jnp.tile(c2, f)])
    return out.reshape(B, H, W, C)


# ----------------------------------------------------------------------------
# Pallas kernel 4: per-channel sum / sum-of-squares (BatchNorm statistics)
# ----------------------------------------------------------------------------
def _bn_stats_kernel(x_ref, sum_ref, ssq_ref):
    @pl.when(pl.program_id(0) == 0)
    def _():
        sum_ref[...] = jnp.zeros_like(sum_ref)
        ssq_ref[...] = jnp.zeros_like(ssq_ref)

    x = x_ref[...]
    sum_ref[...] += jnp.sum(x, axis=0, keepdims=True)
    ssq_ref[...] += jnp.sum(x * x, axis=0, keepdims=True)


def bn_scale_shift(x_nhwc, gamma, beta, eps=1e-5):
    """Training-mode BN (biased batch variance), single HBM pass for the stats."""
    B, H, W, C = x_nhwc.shape
    M = B * H * W
    f = _fold_factor(M, C)
    xf = x_nhwc.reshape(M // f, C * f)
    R, L = xf.shape
    tr, Rp = _row_tiling(R)
    if Rp != R:
        xf = jnp.pad(xf, ((0, Rp - R), (0, 0)))      # zero rows do not change sums
    sum_, ssq = pl.pallas_call(
        _bn_stats_kernel,
        out_shape=(jax.ShapeDtypeStruct((1, L), jnp.float32),
                   jax.ShapeDtypeStruct((1, L), jnp.float32)),
        grid_spec=pltpu.PrefetchScalarGridSpec(
            num_scalar_prefetch=0,
            grid=(Rp // tr,),
            in_specs=[pl.BlockSpec((tr, L), lambda i: (i, 0))],
            out_specs=[pl.BlockSpec((1, L), lambda i: (0, 0)),
                       pl.BlockSpec((1, L), lambda i: (0, 0))],
        ),
        compiler_params=pltpu.CompilerParams(dimension_semantics=("arbitrary",)),
    )(xf)
    s = sum_.reshape(f, C).sum(axis=0)
    ss = ssq.reshape(f, C).sum(axis=0)
    mean = s / M
    var = jnp.maximum(ss / M - mean * mean, 0.0)
    scale = gamma / jnp.sqrt(var + eps)
    shift = beta - mean * scale
    return scale, shift


# ----------------------------------------------------------------------------
# Pallas kernel 5: 3x3 / stride-2 maxpool as a max-tree over 9 shifted views
# ----------------------------------------------------------------------------
def _max_tree_kernel(*refs):
    o_ref = refs[-1]
    m = refs[0][...]
    for r in refs[1:-1]:
        m = jnp.maximum(m, r[...])
    o_ref[...] = m


def maxpool_3x3_s2(x):
    B, H, W, C = x.shape
    k, s, pad = 3, 2, 1
    OH = (H + 2 * pad - k) // s + 1
    OW = (W + 2 * pad - k) // s + 1
    xp = jnp.pad(x, ((0, 0), (pad, pad), (pad, pad), (0, 0)),
                 constant_values=-jnp.inf)
    M = B * OH * OW
    f = _fold_factor(M, C)
    views = []
    for i in range(k):
        for j in range(k):
            v = xp[:, i:i + s * OH:s, j:j + s * OW:s, :]
            views.append(v.reshape(M // f, C * f))
    out = _ew_call(_max_tree_kernel, views, [])
    return out.reshape(B, OH, OW, C)


# ----------------------------------------------------------------------------
# Pallas kernel 6: covariance pooling, channel-last  P = (1/N) Xc^T Xc
# ----------------------------------------------------------------------------
def _cov_kernel(x_ref, o_ref):
    x = x_ref[0]                                   # (N, dim); lane dim = channels
    n = x.shape[0]
    xc = x - jnp.mean(x, axis=0, keepdims=True)
    o_ref[0] = (1.0 / n) * jax.lax.dot_general(
        xc, xc, dimension_numbers=(((0,), (0,)), ((), ())),
        preferred_element_type=jnp.float32)


def covariance_cl(X):
    # X: (B, N, dim) channel-last; equals A @ _I @ A^T of the reference (A = X^T).
    B, N, dim = X.shape
    return pl.pallas_call(
        _cov_kernel,
        out_shape=jax.ShapeDtypeStruct((B, dim, dim), jnp.float32),
        grid_spec=pltpu.PrefetchScalarGridSpec(
            num_scalar_prefetch=0,
            grid=(B,),
            in_specs=[pl.BlockSpec((1, N, dim), lambda b: (b, 0, 0))],
            out_specs=pl.BlockSpec((1, dim, dim), lambda b: (b, 0, 0)),
        ),
        compiler_params=pltpu.CompilerParams(dimension_semantics=("parallel",)),
    )(X)


# ----------------------------------------------------------------------------
# Pallas kernel 7: Newton-Schulz matrix square root (10 iterations, f32)
# ----------------------------------------------------------------------------
def _ns_sqrt_kernel(a_ref, o_ref, *, num_iters):
    A = a_ref[0]                                   # (d, d)
    d = A.shape[0]
    normA = jnp.sqrt(jnp.sum(A * A))
    Y = A / normA
    row = jax.lax.broadcasted_iota(jnp.int32, (d, d), 0)
    col = jax.lax.broadcasted_iota(jnp.int32, (d, d), 1)
    I = (row == col).astype(jnp.float32)
    Z = I
    for _ in range(num_iters):
        T = 0.5 * (3.0 * I - jnp.dot(Z, Y, preferred_element_type=jnp.float32))
        Y = jnp.dot(Y, T, preferred_element_type=jnp.float32)
        Z = jnp.dot(T, Z, preferred_element_type=jnp.float32)
    o_ref[0] = Y * jnp.sqrt(normA)
    # TODO(synk): compute_error() (second return of sqrt_newton_schulz_autograd)
    # is discarded by forward(), so it is not computed here.


def sqrt_newton_schulz(A, num_iters=10):
    B, d, _ = A.shape
    return pl.pallas_call(
        functools.partial(_ns_sqrt_kernel, num_iters=num_iters),
        out_shape=jax.ShapeDtypeStruct((B, d, d), jnp.float32),
        grid_spec=pltpu.PrefetchScalarGridSpec(
            num_scalar_prefetch=0,
            grid=(B,),
            in_specs=[pl.BlockSpec((1, d, d), lambda b: (b, 0, 0))],
            out_specs=pl.BlockSpec((1, d, d), lambda b: (b, 0, 0)),
        ),
        compiler_params=pltpu.CompilerParams(dimension_semantics=("parallel",)),
    )(A)


# ----------------------------------------------------------------------------
# Conv glue: im2col (channel-last column order) + Pallas bf16 matmul
# ----------------------------------------------------------------------------
def im2col(x, kh, kw, stride, pad):
    B, H, W, C = x.shape
    OH = (H + 2 * pad - kh) // stride + 1
    OW = (W + 2 * pad - kw) // stride + 1
    xp = jnp.pad(x, ((0, 0), (pad, pad), (pad, pad), (0, 0))) if pad else x
    views = []
    for i in range(kh):
        for j in range(kw):
            views.append(xp[:, i:i + stride * OH:stride, j:j + stride * OW:stride, :])
    cols = jnp.concatenate(views, axis=-1)            # (B, OH, OW, kh*kw*C)
    return cols.reshape(B * OH * OW, kh * kw * C), OH, OW


def conv2d(x, w, bias=None, stride=1, pad=0):
    # x: NHWC;  w: (Cout, Cin, kh, kw) PyTorch layout
    Cout, Cin, kh, kw = w.shape
    B, H, W, C = x.shape
    assert C == Cin
    if kh == 1 and kw == 1 and pad == 0:
        OH = (H - 1) // stride + 1
        OW = (W - 1) // stride + 1
        cols = x[:, ::stride, ::stride, :].reshape(B * OH * OW, Cin)
        w2d = w.reshape(Cout, Cin).T
    else:
        cols, OH, OW = im2col(x, kh, kw, stride, pad)
        w2d = jnp.transpose(w, (2, 3, 1, 0)).reshape(kh * kw * Cin, Cout)
    y = matmul_affine(cols, w2d, shift=bias)
    return y.reshape(B, OH, OW, Cout)


def basic_block(x, p):
    out = conv2d(x, p['conv1_w'], stride=p['stride'], pad=1)
    s1, c1 = bn_scale_shift(out, p['bn1_g'], p['bn1_b'])
    out = affine_act(out, s1, c1, relu=True)
    out = conv2d(out, p['conv2_w'], stride=1, pad=1)
    s2, c2 = bn_scale_shift(out, p['bn2_g'], p['bn2_b'])
    if 'ds_w' in p:
        idn = conv2d(x, p['ds_w'], stride=p['stride'], pad=0)
        s3, c3 = bn_scale_shift(idn, p['ds_bn_g'], p['ds_bn_b'])
    else:
        idn = x
        C = out.shape[-1]
        s3 = jnp.ones((C,), jnp.float32)
        c3 = jnp.zeros((C,), jnp.float32)
    # Fused: relu(bn2(out) + bn_ds(identity))  (identity BN is the identity affine
    # when there is no downsample path).
    return bn_add_relu(out, s2, c2, idn, s3, c3)


# ----------------------------------------------------------------------------
# Parameter init (deterministic, mirrors the module's __init__)
# ----------------------------------------------------------------------------
def init_params(key, layers=(1, 1, 1, 1), num_classes=16):
    keys = iter(jax.random.split(key, 64))

    def conv_init(k, cout, cin, kh, kw):
        n = kh * kw * cout
        return jax.random.normal(k, (cout, cin, kh, kw), jnp.float32) * math.sqrt(2.0 / n)

    params = {
        'conv1_w': conv_init(next(keys), 64, 3, 7, 7),
        'bn1_g': jnp.ones((64,), jnp.float32),
        'bn1_b': jnp.zeros((64,), jnp.float32),
    }

    expansion = 1                      # BasicBlock
    inplanes = 64
    layer_params = []
    for planes, nblocks, stride in zip((64, 128, 256, 512), layers, (1, 2, 2, 2)):
        blocks = []
        for bi in range(nblocks):
            s = stride if bi == 0 else 1
            p = {
                'conv1_w': conv_init(next(keys), planes, inplanes, 3, 3),
                'bn1_g': jnp.ones((planes,), jnp.float32),
                'bn1_b': jnp.zeros((planes,), jnp.float32),
                'conv2_w': conv_init(next(keys), planes, planes, 3, 3),
                'bn2_g': jnp.ones((planes,), jnp.float32),
                'bn2_b': jnp.zeros((planes,), jnp.float32),
                'stride': s,
            }
            if s != 1 or inplanes != planes * expansion:
                p['ds_w'] = conv_init(next(keys), planes * expansion, inplanes, 1, 1)
                p['ds_bn_g'] = jnp.ones((planes * expansion,), jnp.float32)
                p['ds_bn_b'] = jnp.zeros((planes * expansion,), jnp.float32)
            inplanes = planes * expansion
            blocks.append(p)
        layer_params.append(blocks)
    params['layers'] = layer_params

    cov_in_dim = 256
    cov_out_dim = cov_in_dim * (cov_in_dim + 1) // 2
    params['reduce_w'] = conv_init(next(keys), cov_in_dim, 512 * expansion, 1, 1)
    b = 1.0 / math.sqrt(512 * expansion)
    params['reduce_b'] = jax.random.uniform(next(keys), (cov_in_dim,), jnp.float32, -b, b)
    params['reduce_bn_g'] = jnp.ones((cov_in_dim,), jnp.float32)
    params['reduce_bn_b'] = jnp.zeros((cov_in_dim,), jnp.float32)

    b = 1.0 / math.sqrt(cov_out_dim)
    params['fc_w'] = jax.random.uniform(next(keys), (num_classes, cov_out_dim), jnp.float32, -b, b)
    params['fc_b'] = jax.random.uniform(next(keys), (num_classes,), jnp.float32, -b, b)
    return params


# ----------------------------------------------------------------------------
# Full forward pass
# ----------------------------------------------------------------------------
def mpn_cov_resnet_forward(params, x_nchw):
    x = jnp.transpose(x_nchw, (0, 2, 3, 1)).astype(jnp.float32)      # NCHW -> NHWC

    x = conv2d(x, params['conv1_w'], stride=2, pad=3)
    s, c = bn_scale_shift(x, params['bn1_g'], params['bn1_b'])
    x = affine_act(x, s, c, relu=True)
    x = maxpool_3x3_s2(x)

    for blocks in params['layers']:
        for p in blocks:
            x = basic_block(x, p)

    x = conv2d(x, params['reduce_w'], bias=params['reduce_b'], stride=1, pad=0)
    s, c = bn_scale_shift(x, params['reduce_bn_g'], params['reduce_bn_b'])
    x = affine_act(x, s, c, relu=True)

    B, H, W, C = x.shape                                             # C == 256
    X = x.reshape(B, H * W, C)                                       # channel-last (B, N, dim)
    P = covariance_cl(X)                                             # (B, 256, 256)
    sA = sqrt_newton_schulz(P, num_iters=10)                         # (B, 256, 256)

    # Upper-triangular extraction folded into the FC weight: lower-triangular
    # entries get zero weight, so the FC is a plain contiguous matmul.
    num_classes = params['fc_w'].shape[0]
    rows_idx, cols_idx = jnp.triu_indices(C)
    w_full = jnp.zeros((C * C, num_classes), jnp.float32)
    w_full = w_full.at[rows_idx * C + cols_idx].set(params['fc_w'].T)

    logits = matmul_affine(sA.reshape(B, C * C), w_full, shift=params['fc_b'])
    return logits


if __name__ == "__main__":
    key = jax.random.PRNGKey(0)
    pkey, xkey = jax.random.split(key)
    num_classes = 16
    params = init_params(pkey, layers=(1, 1, 1, 1), num_classes=num_classes)
    x = jax.random.normal(xkey, (2, 3, 64, 64), jnp.float32)         # NCHW like PyTorch
    logits = mpn_cov_resnet_forward(params, x)
    jax.block_until_ready(logits)
    assert logits.shape == (2, num_classes)
    assert bool(jnp.all(jnp.isfinite(logits)))
    print("KERNEL_OK")
</pallas_src>

<mosaic_0001>
module attributes {stable_mosaic.version = 11 : i64} {
  func.func @_matmul_affine_kernel(%arg0: i32, %arg1: i32, %arg2: i32, %arg3: memref<128x256xbf16, #tpu.memory_space<vmem>>, %arg4: memref<256x128xbf16, #tpu.memory_space<vmem>>, %arg5: memref<1x128xf32, #tpu.memory_space<vmem>>, %arg6: memref<1x128xf32, #tpu.memory_space<vmem>>, %arg7: memref<128x128xf32, #tpu.memory_space<vmem>>, %arg8: memref<128x128xf32, #tpu.memory_space<vmem>>) attributes {dimension_semantics = [#tpu.dimension_semantics<parallel>, #tpu.dimension_semantics<parallel>, #tpu.dimension_semantics<arbitrary>], iteration_bounds = array<i64: 1, 16, 1>, scalar_prefetch = 0 : i64, scratch_operands = 1 : i64, tpu.core_type = #tpu.core_type<tc>, window_params = [{transform_indices = @transform_0, window_bounds = array<i64: 128, 256>}, {transform_indices = @transform_1, window_bounds = array<i64: 256, 128>}, {transform_indices = @transform_2, window_bounds = array<i64: 1, 128>}, {transform_indices = @transform_3, window_bounds = array<i64: 1, 128>}, {transform_indices = @transform_4, window_bounds = array<i64: 128, 128>}]} {
    %c0_i32 = arith.constant 0 : i32
    %0 = arith.cmpi eq, %arg2, %c0_i32 : i32
    %1 = arith.extui %0 : i1 to i32
    %c0_i32_0 = arith.constant 0 : i32
    %2 = arith.cmpi ne, %1, %c0_i32_0 : i32
    scf.if %2 {
      %cst_10 = arith.constant 0.000000e+00 : f32
      %12 = vector.broadcast %cst_10 : f32 to vector<128x128xf32>
      %c0_11 = arith.constant 0 : index
      %c0_12 = arith.constant 0 : index
      %13 = vector.load %arg8[%c0_11, %c0_12] : memref<128x128xf32, #tpu.memory_space<vmem>>, vector<128x128xf32>
      tpu.vector_store %arg8[%c0_11, %c0_12], %12 {strides = array<i32>} : memref<128x128xf32, #tpu.memory_space<vmem>>, vector<128x128xf32>,
    } else {
    }
    %c0 = arith.constant 0 : index
    %c0_1 = arith.constant 0 : index
    %3 = vector.load %arg8[%c0, %c0_1] : memref<128x128xf32, #tpu.memory_space<vmem>>, vector<128x128xf32>
    %c0_2 = arith.constant 0 : index
    %c0_3 = arith.constant 0 : index
    %4 = vector.load %arg3[%c0_2, %c0_3] : memref<128x256xbf16, #tpu.memory_space<vmem>>, vector<128x256xbf16>
    %c0_4 = arith.constant 0 : index
    %c0_5 = arith.constant 0 : index
    %5 = vector.load %arg4[%c0_4, %c0_5] : memref<256x128xbf16, #tpu.memory_space<vmem>>, vector<256x128xbf16>
    %cst = arith.constant dense<0.000000e+00> : vector<128x128xf32>
    %6 = tpu.matmul %4, %5, %cst {dimension_numbers = #tpu.dot_dimension_numbers<[1], [0], [0], [1], [0, 0, 1, 1], [], []>} : vector<128x256xbf16>, vector<256x128xbf16>, vector<128x128xf32> -> vector<128x128xf32>
    %7 = arith.addf %3, %6 : vector<128x128xf32>
    %c0_6 = arith.constant 0 : index
    %c0_7 = arith.constant 0 : index
    %8 = vector.load %arg8[%c0_6, %c0_7] : memref<128x128xf32, #tpu.memory_space<vmem>>, vector<128x128xf32>
    tpu.vector_store %arg8[%c0_6, %c0_7], %7 {strides = array<i32>} : memref<128x128xf32, #tpu.memory_space<vmem>>, vector<128x128xf32>,
    %c0_i32_8 = arith.constant 0 : i32
    %9 = arith.cmpi eq, %arg2, %c0_i32_8 : i32
    %10 = arith.extui %9 : i1 to i32
    %c0_i32_9 = arith.constant 0 : i32
    %11 = arith.cmpi ne, %10, %c0_i32_9 : i32
    scf.if %11 {
      %c0_10 = arith.constant 0 : index
      %c0_11 = arith.constant 0 : index
      %12 = vector.load %arg8[%c0_10, %c0_11] : memref<128x128xf32, #tpu.memory_space<vmem>>, vector<128x128xf32>
      %c0_12 = arith.constant 0 : index
      %c0_13 = arith.constant 0 : index
      %13 = vector.load %arg5[%c0_12, %c0_13] : memref<1x128xf32, #tpu.memory_space<vmem>>, vector<1x128xf32>
      %14 = vector.broadcast %13 : vector<1x128xf32> to vector<128x128xf32>
      %15 = arith.mulf %12, %14 : vector<128x128xf32>
      %c0_14 = arith.constant 0 : index
      %c0_15 = arith.constant 0 : index
      %16 = vector.load %arg6[%c0_14, %c0_15] : memref<1x128xf32, #tpu.memory_space<vmem>>, vector<1x128xf32>
      %17 = vector.broadcast %16 : vector<1x128xf32> to vector<128x128xf32>
      %18 = arith.addf %15, %17 : vector<128x128xf32>
      %c0_16 = arith.constant 0 : index
      %c0_17 = arith.constant 0 : index
      %19 = vector.load %arg7[%c0_16, %c0_17] : memref<128x128xf32, #tpu.memory_space<vmem>>, vector<128x128xf32>
      tpu.vector_store %arg7[%c0_16, %c0_17], %18 {strides = array<i32>} : memref<128x128xf32, #tpu.memory_space<vmem>>, vector<128x128xf32>,
    } else {
    }
    return
  }
  func.func @transform_0(%arg0: i32, %arg1: i32, %arg2: i32) -> (i32, i32) {
    %c0_i32 = arith.constant 0 : i32
    return %arg1, %arg2 : i32, i32
  }
  func.func @transform_1(%arg0: i32, %arg1: i32, %arg2: i32) -> (i32, i32) {
    %c0_i32 = arith.constant 0 : i32
    return %arg2, %arg0 : i32, i32
  }
  func.func @transform_2(%arg0: i32, %arg1: i32, %arg2: i32) -> (i32, i32) {
    %c0_i32 = arith.constant 0 : i32
    %c0_i32_0 = arith.constant 0 : i32
    return %c0_i32, %arg0 : i32, i32
  }
  func.func @transform_3(%arg0: i32, %arg1: i32, %arg2: i32) -> (i32, i32) {
    %c0_i32 = arith.constant 0 : i32
    %c0_i32_0 = arith.constant 0 : i32
    return %c0_i32, %arg0 : i32, i32
  }
  func.func @transform_4(%arg0: i32, %arg1: i32, %arg2: i32) -> (i32, i32) {
    %c0_i32 = arith.constant 0 : i32
    return %arg1, %arg0 : i32, i32
  }
}

</mosaic_0001>

<bundles_post_ra>
// kernel: tpu_custom_call.1
= control target key start
LH: loop header
LB: loop body
LE: loop exit
PB: predicated region body
PF: predicated region fallthrough
CT: control target
= control target key end

     0   :  { %s1619_s0 = inlined_call_operand.hbm [shape: bf16[2048,256], index: 0, kind: input, shape index: {}]   ;;  %s1620_s1 = inlined_call_operand.hbm [shape: bf16[256,128], index: 1, kind: input, shape index: {}]   ;;  %s1621_s2 = inlined_call_operand.vmem [shape: f32[1,128], index: 2, kind: input, shape index: {}]   ;;  %s1622_s3 = inlined_call_operand.vmem [shape: f32[1,128], index: 3, kind: input, shape index: {}]   ;;  %s1623_s4 = inlined_call_operand.hbm [shape: f32[2048,128], index: 4, kind: output, shape index: {}]  }
   0x1   :  { %1625 = sst [smem:[#allocation13_spill]] %s1620_s1 }
   0x2   :  { %9 = vsyncpa [#allocation4], 0 }
   0x3   :  { %11 = vsyncpa [#allocation4 + $0x1], 0 }
   0x4   :  { %12 = vsyncpa [#allocation7], 0 }
   0x5   :  { %13 = vsyncpa [#allocation5], 0 }
   0x6   :  { %15 = vsyncpa [#allocation5 + $0x1], 0  ;;  %s1373_s15 = smov 0   ;;  %s1375_s16 = smov 0  }
   0x7   :  { %s1377_s17 = smov 0   ;;  %s1379_s18 = smov 0  }
   0x8   :  { %s1381_s19 = smov 0   ;;  %s1383_s20 = smov 0  }
   0x9 LB: > { %s913_s21 = sadd.s32 4294967295, %s1339_s20   ;;  %s914_s22 = sadd.s32 4294967294, %s1339_s20   ;;  %s1339_s20 = sphi %s1383_s20, %s21_s20   ;;  %s1335_s19 = sphi %s1381_s19, %s1640_s19   ;;  %s1331_s18 = sphi %s1379_s18, %s1639_s18   ;;  %s1327_s17 = sphi %s1377_s17, %s1638_s17   ;;  %s1323_s16 = sphi %s1375_s16, %s1637_s16   ;;  %s1319_s15 = sphi %s1373_s15, %s1636_s15  }
   0xa   : > { %p62_p0 = scmp.ne.s32.totalorder %s1323_s16, %s1319_s15  ;;  %p1407_p1 = scmp.eq.s32.totalorder %s913_s21, 0 }
   0xb   : > { %p1411_p2 = scmp.eq.s32.totalorder %s913_s21, 15  ;;  %p174_p3 = scmp.eq.s32.totalorder %s914_s22, 15 }
   0xc   : > { %p1417_p4 = por %p1407_p1, %p62_p0  ;;  %p915_p5 = scmp.ge.s32.totalorder %s1339_s20, 1 }
   0xd   : > { %p1422_p6 = por %p174_p3, %p62_p0  ;;  %p181_p7 = scmp.lt.s32.totalorder %s1339_s20, 17 }
   0xe   : > { %s1630_s1 = sld [smem:[#allocation13_spill]]  ;;  %s1341_s5 = smov [#allocation6]  }
   0xf   : > { %p1430_p8 = pnand %p915_p5, %p181_p7  ;;  %s198_s6 = sshll.u32 %s1341_s5, 4  ;;  %s199_s6 = int_to_ptr.vmem [resolvable:$true] %s198_s6 }
  0x10   : > { %s1342_s7 = smov 64   ;;  %s1343_s8 = smov 4  }
  0x11   : > { %p1120_p9 = pneg %p1430_p8  ;;  %s36_s9 = sadd.s32 1, %s1335_s19 }
  0x12   : > { %p38_p11 = scmp.ge.s32.totalorder %s36_s9, 16  ;;  %s49_s10 = sadd.s32 1, %s1327_s17 }
  0x13   : > { %p1121_p10 = pnand %p1120_p9, %p1407_p1  ;;  %p56_p12 = scmp.ne.s32.totalorder %s1327_s17, %s1323_s16 }
  0x14   : > { %s196_s29 = sshll.u32 %s1630_s1, 4  ;;  %p57_p13 = scmp.eq.s32.totalorder %s1339_s20, 0  ;;  %s197_s29 = int_to_ptr.hbm [resolvable:$true] %s196_s29 }
  0x15   : > { %1123 = dma.hbm_to_vmem [thread:$0]  (!%p1121_p10), %s197_s29, 2048, %s199_s6, [#allocation7], %s1342_s7, %s1342_s7, %s1343_s8  }
  0x16   : > { %s1642_s9 = smov (%p38_p11, %s36_s9), 0  ;;  %p1445_p0 = por %p57_p13, %p56_p12 }
  0x17   : > { %1632 = sst [smem:[#allocation12_spill]] %s1642_s9  ;;  %p1451_p3 = por %p1411_p2, %p56_p12 }
  0x18   : > { %s44_s13 = ssub.s32 %s1335_s19, %s1642_s9  ;;  %p1133_p5 = scmp.lt.s32.totalorder %s1339_s20, 16 }
  0x19   : > { %p47_p7 = scmp.eq.s32.totalorder %s44_s13, 0  ;;  %s224_s14 = sand.u32 1, %s1327_s17  }
  0x1a   : > { %s920_s21 = sshll.u32 %s224_s14, 7  ;;  %s1062_s27 = sshll.u32 %s1335_s19, 7 }
  0x1b   : > { %s1460_s22 = scalar_select %p47_p7, %s1327_s17, %s49_s10  }
  0x1c   : > { %s236_s5 = scalar_lea.hbm %s1619_s0, %s1062_s27  ;;  %s228_s6 = scalar_lea.vmem [#allocation3], %s920_s21 }
  0x1d   : > { %s239_s7 = sshll.u32 %s228_s6, 4  ;;  %s237_s24 = sshll.u32 %s236_s5, 4  ;;  %s240_s7 = int_to_ptr.vmem [resolvable:$true] %s239_s7  ;;  %s238_s24 = int_to_ptr.hbm [resolvable:$true] %s237_s24 }
  0x1e   : > { %p1125_p2 = pnand %p1133_p5, %p1445_p0  ;;  %s225_s8 = scalar_lea.sflag [#allocation4], %s224_s14 }
  0x1f   : > { %s1344_s1 = smov 128   ;;  %s1345_s9 = smov 8  }
  0x20   : > { %1127 = dma.hbm_to_vmem [thread:$0]  (!%p1125_p2), %s238_s24, 2048, %s240_s7, %s225_s8, %s1344_s1, %s1344_s1, %s1345_s9  }
  0x21   : > { %251 = sbr.rel (%p1430_p8) target bundleno = 272 (0x110), region = 36  ;;  %s1471_s10 = sand.u32 (!%p1430_p8), 1, %s1323_s16  }
  0x22   : > { %s925_s13 = sshll.u32 (!%p1430_p8), %s1471_s10, 7  ;;  %s254_s21 = scalar_lea.sflag (!%p1430_p8), [#allocation4], %s1471_s10 }
  0x23   : > { %s1477_s27 = scalar_lea.vmem (!%p1430_p8), [#allocation3], %s925_s13 }
  0x26   : > { %1306 = dma.done.wait (%p1417_p4), %s254_s21, 2048  }
  0x27   : > { %1308 = vsyncadd (%p1417_p4), %s254_s21, 4294965248 }
  0x28   : > { %1310 = dma.done.wait (%p1407_p1), [#allocation7], 2048  }
  0x29   : > { %1312 = vsyncadd (%p1407_p1), [#allocation7], 4294965248  ;;  %v1086_v0 = vld [vmem:[#allocation6 + $0x38] sm:$0xff]  ;;  %v1085_v2 = vld [vmem:[#allocation6 + $0x30] sm:$0xff]  ;;  %s1533_s9 = scalar_lea.vmem [#allocation8], %s925_s13  ;;  %s1095_s11 = sshll.u32 %s1331_s18, 7 }
  0x2a   : > { %v1094_v1 = vld [vmem:[#allocation6 + $0x78] sm:$0xff]  ;;  %564 = vmatpush.bf16.msra.mxu0 %v1086_v0  ;;  %1096 = vmatpush.bf16.msra.mxu2 %v1086_v0  ;;  %v1093_v3 = vld [vmem:[#allocation6 + $0x70] sm:$0xff]  ;;  %v1084_v4 = vld [vmem:[#allocation6 + $0x28] sm:$0xff]  ;;  %s782_s29 = scalar_lea.hbm %s1623_s4, %s1095_s11  ;;  %s783_s5 = sshll.u32 %s1533_s9, 4  ;;  %s784_s5 = int_to_ptr.vmem [resolvable:$true] %s783_s5 }
  0x2b   : > { %613 = vmatpush.bf16.msra.mxu1 %v1094_v1  ;;  %1104 = vmatpush.bf16.msra.mxu3 %v1094_v1  ;;  %v1092_v5 = vld [vmem:[#allocation6 + $0x68] sm:$0xff]  ;;  %v1083_v6 = vld [vmem:[#allocation6 + $0x20] sm:$0xff]  ;;  %v1082_v8 = vld [vmem:[#allocation6 + $0x18] sm:$0xff]  ;;  %s785_s18 = sshll.u32 %s782_s29, 4  ;;  %s770_s6 = scalar_lea.sflag [#allocation5], %s1471_s10  ;;  %s786_s18 = int_to_ptr.hbm [resolvable:$true] %s785_s18 }
  0x2c   : > { %v1091_v7 = vld [vmem:[#allocation6 + $0x60] sm:$0xff]  ;;  %v1090_v9 = vld [vmem:[#allocation6 + $0x58] sm:$0xff]  ;;  %v1081_v10 = vld [vmem:[#allocation6 + $0x10] sm:$0xff]  ;;  %s1267_s7 = sshra.s32 %s786_s18, 4  ;;  %s1273_s21 = scalar_lea.hbm %s1623_s4, 2048  ;;  %s1268_s7 = int_to_ptr.hbm [resolvable:$true] %s1267_s7 }
  0x2d   : > { %v1089_v11 = vld [vmem:[#allocation6 + $0x50] sm:$0xff]  ;;  %v1080_v12 = vld [vmem:[#allocation6 + $0x8] sm:$0xff]  ;;  %v1079_v14 = vld [vmem:[#allocation6] sm:$0xff]  ;;  %s1269_s24 = scalar_lea.hbm %s1268_s7, 128  ;;  %p1274_p9 = scmp.lt.s32.totalorder %s1268_s7, %s1623_s4 }
  0x2e   : > { %565 = vmatpush.bf16.msra.mxu0 %v1085_v2  ;;  %1097 = vmatpush.bf16.msra.mxu2 %v1085_v2  ;;  %v1088_v13 = vld [vmem:[#allocation6 + $0x48] sm:$0xff]  ;;  %v1087_v15 = vld [vmem:[#allocation6 + $0x40] sm:$0xff]  ;;  %v938_v28 = vld [vmem:[%s1477_s27 + $0x10] sm:$0xf]  ;;  %p1270_p1 = scmp.ne.s32.totalorder %s1268_s7, %s1269_s24  ;;  %p1275_p10 = scmp.lt.s32.totalorder %s1273_s21, %s1269_s24 }
  0x2f   : > { %614 = vmatpush.bf16.msra.mxu1 %v1093_v3  ;;  %1105 = vmatpush.bf16.msra.mxu3 %v1093_v3  ;;  %v930_v16 = vld [vmem:[%s1477_s27] sm:$0xf]  ;;  %v1064_v17 = vld [vmem:[%s1477_s27 + $0x4] sm:$0xf0]  ;;  %v1063_v20 = vld [vmem:[%s1477_s27 + $0x4] sm:$0xf] }
  0x30   : > { %v962_v18 = vld [vmem:[%s1477_s27 + $0x40] sm:$0xf]  ;;  %v1072_v19 = vld [vmem:[%s1477_s27 + $0x44] sm:$0xf0]  ;;  %v932_v21 = vld [vmem:[%s1477_s27 + $0x8] sm:$0xf0]  ;;  %v931_v24 = vor.u32 %v1064_v17, %v930_v16  ;;  %p1271_p4 = pnand %p1270_p1, %p1451_p3  ;;  %p1276_p11 = por %p1275_p10, %p1274_p9 }
  0x31   : > { %v1071_v22 = vld [vmem:[%s1477_s27 + $0x44] sm:$0xf]  ;;  %v964_v23 = vld [vmem:[%s1477_s27 + $0x48] sm:$0xf0]  ;;  %v963_v25 = vor.u32 %v1072_v19, %v962_v18  ;;  %v935_v26 = vor.u32 %v1063_v20, %v932_v21  ;;  %v1066_v29 = vld [vmem:[%s1477_s27 + $0x14] sm:$0xf0] }
  0x32   : > { %566 = vmatpush.bf16.msra.mxu0 %v1084_v4  ;;  %1098 = vmatpush.bf16.msra.mxu2 %v1084_v4  ;;  %v967_v27 = vor.u32 %v1071_v22, %v964_v23  ;;  %v970_v30 = vld [vmem:[%s1477_s27 + $0x50] sm:$0xf]  ;;  %v1074_v31 = vld [vmem:[%s1477_s27 + $0x54] sm:$0xf0]  ;;  %v1065_v32 = vld [vmem:[%s1477_s27 + $0x14] sm:$0xf]  ;;  %v939_v36 = vor.u32 %v1066_v29, %v938_v28  ;;  %p1272_p8 = pneg %p1271_p4 }
  0x33   : > { %615 = vmatpush.bf16.msra.mxu1 %v1092_v5  ;;  %1106 = vmatpush.bf16.msra.mxu3 %v1092_v5  ;;  %v940_v33 = vld [vmem:[%s1477_s27 + $0x18] sm:$0xf0]  ;;  %v1073_v34 = vld [vmem:[%s1477_s27 + $0x54] sm:$0xf]  ;;  %v971_v37 = vor.u32 %v1074_v31, %v970_v30  ;;  %v946_v40 = vld [vmem:[%s1477_s27 + $0x20] sm:$0xf] }
  0x34   : > { %v972_v35 = vld [vmem:[%s1477_s27 + $0x58] sm:$0xf0]  ;;  %v943_v38 = vor.u32 %v1065_v32, %v940_v33  ;;  %v1068_v41 = vld [vmem:[%s1477_s27 + $0x24] sm:$0xf0]  ;;  %v978_v42 = vld [vmem:[%s1477_s27 + $0x60] sm:$0xf]  ;;  %p1277_p12 = pnand %p1276_p11, %p1272_p8 }
  0x35   : > { %v975_v39 = vor.u32 %v1073_v34, %v972_v35  ;;  %v1076_v43 = vld [vmem:[%s1477_s27 + $0x64] sm:$0xf0]  ;;  %v1067_v44 = vld [vmem:[%s1477_s27 + $0x24] sm:$0xf]  ;;  %v948_v45 = vld [vmem:[%s1477_s27 + $0x28] sm:$0xf0]  ;;  %v947_v48 = vor.u32 %v1068_v41, %v946_v40 }
  0x36   : > { %567 = vmatpush.bf16.msra.mxu0 %v1083_v6  ;;  %1099 = vmatpush.bf16.msra.mxu2 %v1083_v6  ;;  %v1075_v46 = vld [vmem:[%s1477_s27 + $0x64] sm:$0xf]  ;;  %v980_v47 = vld [vmem:[%s1477_s27 + $0x68] sm:$0xf0]  ;;  %v979_v49 = vor.u32 %v1076_v43, %v978_v42  ;;  %v951_v50 = vor.u32 %v1067_v44, %v948_v45  ;;  %v954_v52 = vld [vmem:[%s1477_s27 + $0x30] sm:$0xf] }
  0x37   : > { %616 = vmatpush.bf16.msra.mxu1 %v1091_v7  ;;  %1107 = vmatpush.bf16.msra.mxu3 %v1091_v7  ;;  %v983_v51 = vor.u32 %v1075_v46, %v980_v47  ;;  %v1070_v53 = vld [vmem:[%s1477_s27 + $0x34] sm:$0xf0]  ;;  %v986_v54 = vld [vmem:[%s1477_s27 + $0x70] sm:$0xf]  ;;  %v1069_v56 = vld [vmem:[%s1477_s27 + $0x34] sm:$0xf] }
  0x38   : > { %v1078_v55 = vld [vmem:[%s1477_s27 + $0x74] sm:$0xf0]  ;;  %v956_v57 = vld [vmem:[%s1477_s27 + $0x38] sm:$0xf0]  ;;  %v1077_v58 = vld [vmem:[%s1477_s27 + $0x74] sm:$0xf]  ;;  %v955_v60 = vor.u32 %v1070_v53, %v954_v52 }
  0x39   : > { %v988_v59 = vld [vmem:[%s1477_s27 + $0x78] sm:$0xf0]  ;;  %v987_v61 = vor.u32 %v1078_v55, %v986_v54  ;;  %v959_v62 = vor.u32 %v1069_v56, %v956_v57  ;;  %v1522_v1 = vld [vmem:[%s1621_s2] ss:$0 sm:$0xff] }
  0x3a   : > { %568 = vmatpush.bf16.msra.mxu0 %v1082_v8  ;;  %1100 = vmatpush.bf16.msra.mxu2 %v1082_v8  ;;  %v991_v63 = vor.u32 %v1077_v58, %v988_v59  ;;  %v1527_v4 = vld [vmem:[%s1622_s3] ss:$0 sm:$0xff] }
  0x3b   : > { %617 = vmatpush.bf16.msra.mxu1 %v1090_v9  ;;  %1108 = vmatpush.bf16.msra.mxu3 %v1090_v9 }
  0x3e   : > { %569 = vmatpush.bf16.msra.mxu0 %v1081_v10  ;;  %1101 = vmatpush.bf16.msra.mxu2 %v1081_v10 }
  0x3f   : > { %618 = vmatpush.bf16.msra.mxu1 %v1089_v11  ;;  %1109 = vmatpush.bf16.msra.mxu3 %v1089_v11 }
  0x42   : > { %570 = vmatpush.bf16.msra.mxu0 %v1080_v12  ;;  %1102 = vmatpush.bf16.msra.mxu2 %v1080_v12 }
  0x43   : > { %619 = vmatpush.bf16.msra.mxu1 %v1088_v13  ;;  %1110 = vmatpush.bf16.msra.mxu3 %v1088_v13 }
  0x46   : > { %571 = vmatpush.bf16.msra.mxu0 %v1079_v14  ;;  %1103 = vmatpush.bf16.msra.mxu2 %v1079_v14 }
  0x47   : > { %620 = vmatpush.bf16.msra.mxu1 %v1087_v15  ;;  %1111 = vmatpush.bf16.msra.mxu3 %v1087_v15 }
  0x49   : > { %572 = vmatmul.bf16.vlgmr.msra.gmra.mxu0 %v931_v24  ;;  %592 = vmatmul.bf16.vlgmr.msra.gmra.mxu2 %v963_v25 }
  0x4a   : > { %621 = vmatmul.bf16.vlgmr.msra.gmra.mxu1 %v935_v26  ;;  %641 = vmatmul.bf16.vlgmr.msra.gmra.mxu3 %v967_v27 }
  0x59   : > { %577 = vmatmul.bf16.gmra.mxu0 %v939_v36  ;;  %597 = vmatmul.bf16.gmra.mxu2 %v971_v37 }
  0x5a   : > { %626 = vmatmul.bf16.gmra.mxu1 %v943_v38  ;;  %646 = vmatmul.bf16.gmra.mxu3 %v975_v39 }
  0x69   : > { %582 = vmatmul.bf16.gmra.mxu0 %v947_v48  ;;  %602 = vmatmul.bf16.gmra.mxu2 %v979_v49 }
  0x6a   : > { %631 = vmatmul.bf16.gmra.mxu1 %v951_v50  ;;  %651 = vmatmul.bf16.gmra.mxu3 %v983_v51 }
  0x79   : > { %587 = vmatmul.bf16.gmra.mxu0 %v955_v60  ;;  %607 = vmatmul.bf16.gmra.mxu2 %v987_v61 }
  0x7a   : > { %636 = vmatmul.bf16.gmra.mxu1 %v959_v62  ;;  %656 = vmatmul.bf16.gmra.mxu3 %v991_v63 }
  0xc6   : > { %v573_v0 = vpop.f32.mrf.mxu0 }
  0xc7   : > { %v622_v2 = vpop.f32.mrf.mxu1 }
  0xc8   : > { %v623_v3 = vadd.f32 %v622_v2, %v573_v0 }
  0xca   : > { %v717_v5 = vmul.f32 %v1522_v1, %v623_v3 }
  0xcc   : > { %v737_v6 = vadd.f32 %v1527_v4, %v717_v5  ;;  %v593_v7 = vpop.f32.mrf.mxu2 }
  0xcd   : > { %v642_v8 = vpop.f32.mrf.mxu3 }
  0xce   : > { %753 = vst [vmem:[%s1533_s9] sm:$0xff] %v737_v6  ;;  %v643_v9 = vadd.f32 %v642_v8, %v593_v7  ;;  %v575_v10 = vpop.f32.mrf.mxu0 }
  0xcf   : > { %v624_v11 = vpop.f32.mrf.mxu1 }
  0xd0   : > { %v725_v12 = vmul.f32 %v1522_v1, %v643_v9  ;;  %v625_v13 = vadd.f32 %v624_v11, %v575_v10 }
  0xd2   : > { %v745_v14 = vadd.f32 %v1527_v4, %v725_v12  ;;  %v718_v15 = vmul.f32 %v1522_v1, %v625_v13 }
  0xd4   : > { %761 = vst [vmem:[%s1533_s9 + $0x40] sm:$0xff] %v745_v14  ;;  %v738_v16 = vadd.f32 %v1527_v4, %v718_v15  ;;  %v595_v17 = vpop.f32.mrf.mxu2 }
  0xd5   : > { %v644_v18 = vpop.f32.mrf.mxu3 }
  0xd6   : > { %754 = vst [vmem:[%s1533_s9 + $0x8] sm:$0xff] %v738_v16  ;;  %v645_v19 = vadd.f32 %v644_v18, %v595_v17  ;;  %v578_v20 = vpop.f32.mrf.mxu0 }
  0xd7   : > { %v627_v21 = vpop.f32.mrf.mxu1 }
  0xd8   : > { %v726_v22 = vmul.f32 %v1522_v1, %v645_v19  ;;  %v628_v23 = vadd.f32 %v627_v21, %v578_v20 }
  0xda   : > { %v746_v24 = vadd.f32 %v1527_v4, %v726_v22  ;;  %v719_v25 = vmul.f32 %v1522_v1, %v628_v23 }
  0xdc   : > { %762 = vst [vmem:[%s1533_s9 + $0x48] sm:$0xff] %v746_v24  ;;  %v739_v26 = vadd.f32 %v1527_v4, %v719_v25  ;;  %v598_v27 = vpop.f32.mrf.mxu2 }
  0xdd   : > { %v647_v28 = vpop.f32.mrf.mxu3 }
  0xde   : > { %755 = vst [vmem:[%s1533_s9 + $0x10] sm:$0xff] %v739_v26  ;;  %v648_v29 = vadd.f32 %v647_v28, %v598_v27  ;;  %v580_v30 = vpop.f32.mrf.mxu0 }
  0xdf   : > { %v629_v31 = vpop.f32.mrf.mxu1 }
  0xe0   : > { %v727_v32 = vmul.f32 %v1522_v1, %v648_v29  ;;  %v630_v33 = vadd.f32 %v629_v31, %v580_v30 }
  0xe2   : > { %v747_v34 = vadd.f32 %v1527_v4, %v727_v32  ;;  %v720_v35 = vmul.f32 %v1522_v1, %v630_v33 }
  0xe4   : > { %763 = vst [vmem:[%s1533_s9 + $0x50] sm:$0xff] %v747_v34  ;;  %v740_v36 = vadd.f32 %v1527_v4, %v720_v35  ;;  %v600_v37 = vpop.f32.mrf.mxu2 }
  0xe5   : > { %v649_v38 = vpop.f32.mrf.mxu3 }
  0xe6   : > { %756 = vst [vmem:[%s1533_s9 + $0x18] sm:$0xff] %v740_v36  ;;  %v650_v39 = vadd.f32 %v649_v38, %v600_v37  ;;  %v583_v40 = vpop.f32.mrf.mxu0 }
  0xe7   : > { %v632_v41 = vpop.f32.mrf.mxu1 }
  0xe8   : > { %v728_v42 = vmul.f32 %v1522_v1, %v650_v39  ;;  %v633_v43 = vadd.f32 %v632_v41, %v583_v40 }
  0xea   : > { %v748_v44 = vadd.f32 %v1527_v4, %v728_v42  ;;  %v721_v45 = vmul.f32 %v1522_v1, %v633_v43 }
  0xec   : > { %764 = vst [vmem:[%s1533_s9 + $0x58] sm:$0xff] %v748_v44  ;;  %v741_v46 = vadd.f32 %v1527_v4, %v721_v45  ;;  %v603_v47 = vpop.f32.mrf.mxu2 }
  0xed   : > { %v652_v48 = vpop.f32.mrf.mxu3 }
  0xee   : > { %757 = vst [vmem:[%s1533_s9 + $0x20] sm:$0xff] %v741_v46  ;;  %v653_v49 = vadd.f32 %v652_v48, %v603_v47  ;;  %v585_v50 = vpop.f32.mrf.mxu0 }
  0xef   : > { %v634_v51 = vpop.f32.mrf.mxu1 }
  0xf0   : > { %v729_v52 = vmul.f32 %v1522_v1, %v653_v49  ;;  %v635_v53 = vadd.f32 %v634_v51, %v585_v50 }
  0xf2   : > { %v749_v54 = vadd.f32 %v1527_v4, %v729_v52  ;;  %v722_v55 = vmul.f32 %v1522_v1, %v635_v53 }
  0xf4   : > { %765 = vst [vmem:[%s1533_s9 + $0x60] sm:$0xff] %v749_v54  ;;  %v742_v56 = vadd.f32 %v1527_v4, %v722_v55  ;;  %v605_v57 = vpop.f32.mrf.mxu2 }
  0xf5   : > { %v654_v58 = vpop.f32.mrf.mxu3 }
  0xf6   : > { %758 = vst [vmem:[%s1533_s9 + $0x28] sm:$0xff] %v742_v56  ;;  %v655_v59 = vadd.f32 %v654_v58, %v605_v57  ;;  %v588_v60 = vpop.f32.mrf.mxu0 }
  0xf7   : > { %v637_v61 = vpop.f32.mrf.mxu1 }
  0xf8   : > { %v730_v62 = vmul.f32 %v1522_v1, %v655_v59  ;;  %v638_v63 = vadd.f32 %v637_v61, %v588_v60 }
  0xfa   : > { %v750_v0 = vadd.f32 %v1527_v4, %v730_v62  ;;  %v723_v2 = vmul.f32 %v1522_v1, %v638_v63 }
  0xfc   : > { %766 = vst [vmem:[%s1533_s9 + $0x68] sm:$0xff] %v750_v0  ;;  %v743_v3 = vadd.f32 %v1527_v4, %v723_v2  ;;  %v608_v5 = vpop.f32.mrf.mxu2 }
  0xfd   : > { %v657_v6 = vpop.f32.mrf.mxu3 }
  0xfe   : > { %759 = vst [vmem:[%s1533_s9 + $0x30] sm:$0xff] %v743_v3  ;;  %v658_v7 = vadd.f32 %v657_v6, %v608_v5  ;;  %v590_v8 = vpop.f32.mrf.mxu0 }
  0xff   : > { %v639_v9 = vpop.f32.mrf.mxu1 }
 0x100   : > { %v731_v10 = vmul.f32 %v1522_v1, %v658_v7  ;;  %v640_v11 = vadd.f32 %v639_v9, %v590_v8 }
 0x102   : > { %v751_v12 = vadd.f32 %v1527_v4, %v731_v10  ;;  %v724_v13 = vmul.f32 %v1522_v1, %v640_v11 }
 0x104   : > { %767 = vst [vmem:[%s1533_s9 + $0x70] sm:$0xff] %v751_v12  ;;  %v744_v14 = vadd.f32 %v1527_v4, %v724_v13  ;;  %v610_v15 = vpop.f32.mrf.mxu2 }
 0x105   : > { %v659_v16 = vpop.f32.mrf.mxu3 }
 0x106   : > { %760 = vst [vmem:[%s1533_s9 + $0x38] sm:$0xff] %v744_v14  ;;  %v660_v17 = vadd.f32 %v659_v16, %v610_v15 }
 0x108   : > { %v732_v18 = vmul.f32 %v1522_v1, %v660_v17 }
 0x10a   : > { %v752_v19 = vadd.f32 %v1527_v4, %v732_v18 }
 0x10c   : > { %768 = vst [vmem:[%s1533_s9 + $0x78] sm:$0xff] %v752_v19 }
 0x10d   : > { %1280 = shalt.err (!%p1277_p12)
}
 0x10e   : > { %s1346_s10 = smov 128   ;;  %s1347_s23 = smov 8  }
 0x10f   : > { %1118 = dma.vmem_to_hbm [thread:$0]  (%p1451_p3), %s784_s5, 2048, %s786_s18, %s770_s6, %s1346_s10, %s1346_s10, %s1347_s23  }
 0x110 PF: > { %p1135_p13 = scmp.ge.s32.totalorder %s1339_s20, 2  ;;  %s800_s25 = sand.u32 1, %s1319_s15  }
 0x111   : > { %s801_s30 = scalar_lea.sflag [#allocation5], %s800_s25 }
 0x112   : > { %p1129_p0 = pnand %p1135_p13, %p1422_p6 }
 0x114   : > { %p1130_p5 = pneg %p1129_p0 }
 0x116   : > { %1314 = dma.done.wait (%p1130_p5), %s801_s30, 2048  }
 0x117   : > { %1316 = vsyncadd (%p1130_p5), %s801_s30, 4294965248  ;;  %s21_s20 = sadd.s32 1, %s1339_s20   ;;  %s1635_s12 = sld [smem:[#allocation12_spill]] }
 0x118   : > { %p18_p7 = scmp.ge.s32.totalorder %s21_s20, 18   ;;  %s1636_s15 = smov %s1323_s16 }
 0x119   : > { %s1637_s16 = smov %s1327_s17  ;;  %s1638_s17 = smov %s1460_s22 }
 0x11a   : > { %s1639_s18 = smov %s1335_s19  ;;  %20 = sbr.rel (!%p18_p7) target bundleno = 9 (0x9), region = 100 }
 0x11d   : > { %s1640_s19 = smov %s1635_s12 }
 0x11f   :  { %807 = vsyncpa [#allocation4], 1 }
 0x120   :  { %809 = vsyncpa [#allocation4 + $0x1], 1 }
 0x121   :  { %810 = vsyncpa [#allocation7], 1 }
 0x122   :  { %811 = vsyncpa [#allocation5], 1 }
 0x123   :  { %813 = vsyncpa [#allocation5 + $0x1], 1 }

</bundles_post_ra>
